<compile_context>
chip_gen: v5e
topology: v5e:2x2
jax: 0.10.0
libtpu: 0.0.40
codegen_flags: <defaults>
</compile_context>

<pallas_src>
import functools

import jax
import jax.numpy as jnp
from jax.experimental import pallas as pl
from jax.experimental.pallas import tpu as pltpu

_LANES = 128
_SUBLANES = 8


# ---------------------------------------------------------------------------
# Pallas kernels
# ---------------------------------------------------------------------------
def _minmax_kernel(x_ref, min_ref, max_ref, *, block_rows, blocks_per_partial,
                   last_block, nrows, needs_mask):
    """Per-lane (8,128) min/max partials, output-resident accumulator (P3).

    Grid = (num_partials, blocks_per_partial).  Axis 0 is 'parallel' (one
    partial per TensorCore on v7x); axis 1 is the 'arbitrary' reduction axis.
    Masking (iota + compare + selects) is paid on the tail block only.
    """
    p = pl.program_id(0)
    i = pl.program_id(1)

    @pl.when(i == 0)
    def _():
        min_ref[...] = jnp.full(min_ref.shape, jnp.inf, jnp.float32)
        max_ref[...] = jnp.full(max_ref.shape, -jnp.inf, jnp.float32)

    x = x_ref[...].astype(jnp.float32)

    def fold(x_lo, x_hi):
        if block_rows % _SUBLANES == 0:
            # Fold the block into (8,128) per-lane partials: pure VPU
            # elementwise mins/maxes, no per-step cross-lane (XLU) reduce.
            part_lo = jnp.min(x_lo.reshape(-1, _SUBLANES, _LANES), axis=0)
            part_hi = jnp.max(x_hi.reshape(-1, _SUBLANES, _LANES), axis=0)
        else:
            # Tiny, oddly-shaped single block: reduce to a scalar, broadcast.
            part_lo = jnp.min(x_lo)
            part_hi = jnp.max(x_hi)
        min_ref[...] = jnp.minimum(min_ref[...], part_lo)
        max_ref[...] = jnp.maximum(max_ref[...], part_hi)

    if needs_mask:
        # Clamped duplicate blocks from the index_map re-read the (masked) tail
        # block; re-reading is harmless because min/max is idempotent.
        blk = jnp.minimum(p * blocks_per_partial + i, last_block)
        is_tail = blk == last_block

        @pl.when(is_tail)
        def _():
            row0 = blk * block_rows
            row_ids = row0 + jax.lax.broadcasted_iota(jnp.int32, x.shape, 0)
            valid = row_ids < nrows
            fold(jnp.where(valid, x, jnp.inf), jnp.where(valid, x, -jnp.inf))

        @pl.when(jnp.logical_not(is_tail))
        def _():
            fold(x, x)
    else:
        fold(x, x)


def _quant_dequant_kernel(params_ref, x_ref, o_ref, *, n_levels):
    """Elementwise fake-quant hot path: round, shift, clamp, dequant.

    params_ref (SMEM, f32[3]) = [|delta|, 1/|delta|, zero_point] (hoisted).
    Input/output blocks stay in the caller's dtype; math is f32 in-register.
    """
    delta = params_ref[0]        # |delta|  (grad_scale forward value)
    inv_delta = params_ref[1]    # 1 / |delta|  (vmul instead of vector divide)
    zp = params_ref[2]
    x = x_ref[...].astype(jnp.float32)
    x_int = jnp.round(x * inv_delta) + zp        # round_ste forward == round
    x_quant = jnp.clip(x_int, 0.0, float(n_levels - 1))
    o_ref[...] = ((x_quant - zp) * delta).astype(o_ref.dtype)


# ---------------------------------------------------------------------------
# Wrappers
# ---------------------------------------------------------------------------
def _to_slab(x):
    """Flatten to a lane-dense (rows, 128) slab in x's NATIVE dtype.

    Only pads (one extra HBM round-trip) when numel is not a multiple of 128;
    the common aligned case is a free reshape.
    # TODO(synk): handle the rare numel % 128 != 0 tail with an in-kernel mask
    # instead of jnp.pad + post-slice.
    """
    flat = jnp.ravel(x)
    n = flat.shape[0]
    pad = (-n) % _LANES
    if pad:
        flat = jnp.pad(flat, (0, pad))
    return flat.reshape(-1, _LANES), n, pad


def _block_target_bytes():
    """Generation-aware block size (per buffered block, per array)."""
    try:
        kind = jax.devices()[0].device_kind.lower()
    except Exception:  # pragma: no cover - defensive
        kind = ""
    if ("v6" in kind) or ("v7" in kind):
        # 4 MiB blocks: in+out double-buffered = 16 MiB, inside the 32 MiB
        # default scoped VMEM on v6e/v7x; amortizes step overhead vs 3.2 TB/s.
        return 4 << 20
    # v5e / unknown: 2 MiB blocks -> 8 MiB double-buffered, well inside the
    # 16 MiB default scoped VMEM; v5e is already deep in the mem-bound regime.
    return 2 << 20


def _pick_block_rows(rows, itemsize):
    target = max(_SUBLANES, _block_target_bytes() // (_LANES * itemsize))
    return rows if rows <= target else target


def _pallas_minmax(slab):
    rows = slab.shape[0]
    br = _pick_block_rows(rows, slab.dtype.itemsize)
    total_blocks = pl.cdiv(rows, br)
    num_partials = 2 if total_blocks >= 2 else 1   # v7x: one partial per TC
    bpp = pl.cdiv(total_blocks, num_partials)
    last_block = total_blocks - 1
    needs_mask = (rows % br) != 0

    mn, mx = pl.pallas_call(
        functools.partial(_minmax_kernel, block_rows=br,
                          blocks_per_partial=bpp, last_block=last_block,
                          nrows=rows, needs_mask=needs_mask),
        out_shape=(jax.ShapeDtypeStruct((num_partials * _SUBLANES, _LANES), jnp.float32),
                   jax.ShapeDtypeStruct((num_partials * _SUBLANES, _LANES), jnp.float32)),
        grid_spec=pltpu.PrefetchScalarGridSpec(
            num_scalar_prefetch=0,
            grid=(num_partials, bpp),
            in_specs=[pl.BlockSpec(
                (br, _LANES),
                lambda p, i: (jnp.minimum(p * bpp + i, last_block), 0))],
            out_specs=(pl.BlockSpec((_SUBLANES, _LANES), lambda p, i: (p, 0)),
                       pl.BlockSpec((_SUBLANES, _LANES), lambda p, i: (p, 0)))),
        compiler_params=pltpu.CompilerParams(
            dimension_semantics=("parallel", "arbitrary")),
    )(slab)
    # Tiny cross-lane reduce of the per-lane partials (at most 2*8*128 elems).
    return jnp.min(mn), jnp.max(mx)


def _pallas_quant_dequant(slab, params, n_levels):
    rows = slab.shape[0]
    br = _pick_block_rows(rows, slab.dtype.itemsize)
    return pl.pallas_call(
        functools.partial(_quant_dequant_kernel, n_levels=n_levels),
        out_shape=jax.ShapeDtypeStruct(slab.shape, slab.dtype),
        grid_spec=pltpu.PrefetchScalarGridSpec(
            num_scalar_prefetch=0,
            grid=(pl.cdiv(rows, br),),
            in_specs=[pl.BlockSpec(memory_space=pltpu.MemorySpace.SMEM),  # params
                      pl.BlockSpec((br, _LANES), lambda i: (i, 0))],
            out_specs=pl.BlockSpec((br, _LANES), lambda i: (i, 0))),
        compiler_params=pltpu.CompilerParams(
            dimension_semantics=("parallel",)),   # megacore-shardable hot path
    )(params, slab)


class UniformAffineQuantizer:
    """JAX/Pallas port of the PyTorch UniformAffineQuantizer forward pass."""

    def __init__(self, n_bits: int = 8, symmetric: bool = False,
                 channel_wise: bool = False, scale_method: str = 'max',
                 leaf_param: bool = False):
        assert 2 <= n_bits <= 8, 'bitwidth not supported'
        self.sym = symmetric
        self.n_bits = n_bits
        self.n_levels = 2 ** n_bits
        self.delta = None
        self.zero_point = None
        self.params = None          # cached SMEM params [|d|, 1/|d|, zp]
        self.inited = False
        self.leaf_param = leaf_param
        self.channel_wise = channel_wise
        self.scale_method = scale_method

    def init_quantization_scale(self, x):
        # TODO(synk): channel_wise=True and scale_method='mse' init paths not ported.
        if self.channel_wise or 'max' not in self.scale_method:
            raise NotImplementedError
        # Lane-tail zero padding (if any) is harmless: x_min/x_max are clamped
        # to include 0 below, matching the torch 'max' scale method.
        slab, _, _ = _to_slab(x)
        raw_min, raw_max = _pallas_minmax(slab)
        x_min = jnp.minimum(raw_min, 0.0)
        x_max = jnp.maximum(raw_max, 0.0)
        if 'scale' in self.scale_method:
            x_min = x_min * (self.n_bits + 2) / 8
            x_max = x_max * (self.n_bits + 2) / 8
        x_absmax = jnp.maximum(jnp.abs(x_min), x_max)
        if self.sym:
            x_min = jnp.where(x_min < 0, -x_absmax, 0.0)
            x_max = x_absmax
        delta = (x_max - x_min) / (self.n_levels - 1)
        delta = jnp.maximum(delta, 1e-8)          # clamp near-zero range
        zero_point = jnp.round(-x_min / delta)
        return delta.astype(jnp.float32), zero_point.astype(jnp.float32)

    def __call__(self, x):
        if not self.inited:
            self.delta, self.zero_point = self.init_quantization_scale(x)
            # Hoist scalar math once: [|delta|, 1/|delta|, zero_point] -> SMEM.
            abs_delta = jnp.abs(self.delta)
            self.params = jnp.stack(
                [abs_delta, 1.0 / abs_delta, self.zero_point]).astype(jnp.float32)
            self.inited = True
        # delta_grad_scale only affects the backward pass (grad_scale forward == |delta|).
        slab, n, pad = _to_slab(x)
        out = _pallas_quant_dequant(slab, self.params, self.n_levels)
        if pad:
            out = out.reshape(-1)[:n]
        return out.reshape(x.shape)      # already in x.dtype (kernel-side cast)


if __name__ == "__main__":
    key = jax.random.PRNGKey(0)
    x = jax.random.normal(key, (2, 4, 16, 16), dtype=jnp.float32)  # NCHW

    quantizer = UniformAffineQuantizer(n_bits=8, symmetric=False,
                                       channel_wise=False, scale_method='max')
    y = quantizer(x)
    y = jax.block_until_ready(y)

    # Pure-JAX reference of the same forward pass (uses the same x*(1/delta)
    # formulation as the kernel; identical to torch's x/delta up to 1 f32 ulp).
    n_levels = 256
    x_min = jnp.minimum(jnp.min(x), 0.0)
    x_max = jnp.maximum(jnp.max(x), 0.0)
    delta = jnp.maximum((x_max - x_min) / (n_levels - 1), 1e-8)
    zp = jnp.round(-x_min / delta)
    x_int = jnp.round(x * (1.0 / delta)) + zp
    x_q = jnp.clip(x_int, 0.0, float(n_levels - 1))
    ref = (x_q - zp) * delta

    assert y.shape == x.shape and y.dtype == x.dtype
    assert jnp.allclose(y, ref, atol=1e-6), float(jnp.max(jnp.abs(y - ref)))
    print("KERNEL_OK")
</pallas_src>

<mosaic_0001>
module attributes {stable_mosaic.version = 11 : i64} {
  func.func @_minmax_kernel(%arg0: i32, %arg1: i32, %arg2: memref<16x128xf32, #tpu.memory_space<vmem>>, %arg3: memref<8x128xf32, #tpu.memory_space<vmem>>, %arg4: memref<8x128xf32, #tpu.memory_space<vmem>>) attributes {dimension_semantics = [#tpu.dimension_semantics<parallel>, #tpu.dimension_semantics<arbitrary>], iteration_bounds = array<i64: 1, 1>, scalar_prefetch = 0 : i64, scratch_operands = 0 : i64, tpu.core_type = #tpu.core_type<tc>, window_params = [{transform_indices = @transform_0, window_bounds = array<i64: 16, 128>}, {transform_indices = @transform_1, window_bounds = array<i64: 8, 128>}, {transform_indices = @transform_2, window_bounds = array<i64: 8, 128>}]} {
    %c0_i32 = arith.constant 0 : i32
    %0 = arith.cmpi eq, %arg1, %c0_i32 : i32
    %1 = arith.extui %0 : i1 to i32
    %c0_i32_0 = arith.constant 0 : i32
    %2 = arith.cmpi ne, %1, %c0_i32_0 : i32
    scf.if %2 {
      %cst_11 = arith.constant 0x7F800000 : f32
      %14 = vector.broadcast %cst_11 : f32 to vector<8x128xf32>
      %c0_12 = arith.constant 0 : index
      %c0_13 = arith.constant 0 : index
      %15 = vector.load %arg3[%c0_12, %c0_13] : memref<8x128xf32, #tpu.memory_space<vmem>>, vector<8x128xf32>
      tpu.vector_store %arg3[%c0_12, %c0_13], %14 {strides = array<i32>} : memref<8x128xf32, #tpu.memory_space<vmem>>, vector<8x128xf32>,
      %cst_14 = arith.constant 0xFF800000 : f32
      %16 = vector.broadcast %cst_14 : f32 to vector<8x128xf32>
      %c0_15 = arith.constant 0 : index
      %c0_16 = arith.constant 0 : index
      %17 = vector.load %arg4[%c0_15, %c0_16] : memref<8x128xf32, #tpu.memory_space<vmem>>, vector<8x128xf32>
      tpu.vector_store %arg4[%c0_15, %c0_16], %16 {strides = array<i32>} : memref<8x128xf32, #tpu.memory_space<vmem>>, vector<8x128xf32>,
    } else {
    }
    %c0 = arith.constant 0 : index
    %c0_1 = arith.constant 0 : index
    %3 = vector.load %arg2[%c0, %c0_1] : memref<16x128xf32, #tpu.memory_space<vmem>>, vector<16x128xf32>
    %4 = vector.shape_cast %3 : vector<16x128xf32> to vector<2x8x128xf32>
    %cst = arith.constant dense<0x7F800000> : vector<8x128xf32>
    %5 = vector.multi_reduction <minimumf>, %4, %cst [0] : vector<2x8x128xf32> to vector<8x128xf32>
    %6 = vector.shape_cast %3 : vector<16x128xf32> to vector<2x8x128xf32>
    %cst_2 = arith.constant dense<0xFF800000> : vector<8x128xf32>
    %7 = vector.multi_reduction <maximumf>, %6, %cst_2 [0] : vector<2x8x128xf32> to vector<8x128xf32>
    %c0_3 = arith.constant 0 : index
    %c0_4 = arith.constant 0 : index
    %8 = vector.load %arg3[%c0_3, %c0_4] : memref<8x128xf32, #tpu.memory_space<vmem>>, vector<8x128xf32>
    %9 = arith.minimumf %8, %5 : vector<8x128xf32>
    %c0_5 = arith.constant 0 : index
    %c0_6 = arith.constant 0 : index
    %10 = vector.load %arg3[%c0_5, %c0_6] : memref<8x128xf32, #tpu.memory_space<vmem>>, vector<8x128xf32>
    tpu.vector_store %arg3[%c0_5, %c0_6], %9 {strides = array<i32>} : memref<8x128xf32, #tpu.memory_space<vmem>>, vector<8x128xf32>,
    %c0_7 = arith.constant 0 : index
    %c0_8 = arith.constant 0 : index
    %11 = vector.load %arg4[%c0_7, %c0_8] : memref<8x128xf32, #tpu.memory_space<vmem>>, vector<8x128xf32>
    %12 = arith.maximumf %11, %7 : vector<8x128xf32>
    %c0_9 = arith.constant 0 : index
    %c0_10 = arith.constant 0 : index
    %13 = vector.load %arg4[%c0_9, %c0_10] : memref<8x128xf32, #tpu.memory_space<vmem>>, vector<8x128xf32>
    tpu.vector_store %arg4[%c0_9, %c0_10], %12 {strides = array<i32>} : memref<8x128xf32, #tpu.memory_space<vmem>>, vector<8x128xf32>,
    return
  }
  func.func @transform_0(%arg0: i32, %arg1: i32) -> (i32, i32) {
    %c1_i32 = arith.constant 1 : i32
    %0 = arith.muli %arg0, %c1_i32 : i32
    %1 = arith.addi %0, %arg1 : i32
    %c0_i32 = arith.constant 0 : i32
    %2 = arith.minsi %1, %c0_i32 : i32
    %c0_i32_0 = arith.constant 0 : i32
    %c0_i32_1 = arith.constant 0 : i32
    return %2, %c0_i32_0 : i32, i32
  }
  func.func @transform_1(%arg0: i32, %arg1: i32) -> (i32, i32) {
    %c0_i32 = arith.constant 0 : i32
    %c0_i32_0 = arith.constant 0 : i32
    return %arg0, %c0_i32 : i32, i32
  }
  func.func @transform_2(%arg0: i32, %arg1: i32) -> (i32, i32) {
    %c0_i32 = arith.constant 0 : i32
    %c0_i32_0 = arith.constant 0 : i32
    return %arg0, %c0_i32 : i32, i32
  }
}

</mosaic_0001>

<bundles_post_ra>
// kernel: tpu_custom_call.1
= control target key start
LH: loop header
LB: loop body
LE: loop exit
PB: predicated region body
PF: predicated region fallthrough
CT: control target
= control target key end

     0   :  { %8 = vsyncpa [#allocation3], 0  ;;  %s203_s0 = inlined_call_operand.hbm [shape: f32[16,128], index: 0, kind: input, shape index: {}]   ;;  %s204_s1 = inlined_call_operand.hbm [shape: f32[8,128], index: 1, kind: output, shape index: {0}]   ;;  %s205_s2 = inlined_call_operand.hbm [shape: f32[8,128], index: 2, kind: output, shape index: {1}]  }
   0x1   :  { %9 = vsyncpa [#allocation4], 0 }
   0x2   :  { %10 = vsyncpa [#allocation7], 0  ;;  %s21_s11 = sshll.u32 %s203_s0, 4  ;;  %s174_s12 = smov [#allocation2]   ;;  %s22_s11 = int_to_ptr.hbm [resolvable:$true] %s21_s11 }
   0x3   :  { %s23_s13 = sshll.u32 %s174_s12, 4  ;;  %s175_s14 = smov 128   ;;  %s24_s13 = int_to_ptr.vmem [resolvable:$true] %s23_s13 }
   0x4   :  { %s176_s15 = smov 8  }
   0x5   :  { %29 = dma.hbm_to_vmem [thread:$0]  %s22_s11, 256, %s24_s13, [#allocation3], %s175_s14, %s175_s14, %s176_s15  }
   0x6   :  { %168 = dma.done.wait [#allocation3], 256  }
   0x7   :  { %169 = vsyncadd [#allocation3], 4294967040  ;;  %v44_v0 = vld [vmem:[#allocation2] sm:$0xff]  ;;  %v45_v1 = vld [vmem:[#allocation2 + $0x8] sm:$0xff]  ;;  %s177_s16 = smov [#allocation5]   ;;  %s61_s20 = sshll.u32 %s204_s1, 4  ;;  %s62_s20 = int_to_ptr.hbm [resolvable:$true] %s61_s20 }
   0x8   :  { %s59_s17 = sshll.u32 %s177_s16, 4  ;;  %v46_v2 = vmin.f32 %v44_v0, %v45_v1  ;;  %v47_v3 = vmax.f32 %v44_v0, %v45_v1  ;;  %s178_s0 = smov [#allocation6]   ;;  %s60_s17 = int_to_ptr.vmem [resolvable:$true] %s59_s17 }
   0x9   :  { %s70_s21 = sshll.u32 %s178_s0, 4  ;;  %s72_s24 = sshll.u32 %s205_s2, 4  ;;  %s71_s21 = int_to_ptr.vmem [resolvable:$true] %s70_s21  ;;  %s73_s24 = int_to_ptr.hbm [resolvable:$true] %s72_s24 }
   0xa   :  { %50 = vst [vmem:[#allocation5] sm:$0xff] %v46_v2 }
   0xb   :  { %53 = vst [vmem:[#allocation6] sm:$0xff] %v47_v3  ;;  %64 = dma.vmem_to_hbm [thread:$0]  %s60_s17, 128, %s62_s20, [#allocation4]  }
   0xc   :  { %75 = dma.vmem_to_hbm [thread:$0]  %s71_s21, 128, %s73_s24, [#allocation7]  }
   0xd   :  { %170 = dma.done.wait [#allocation4], 128  }
   0xe   :  { %171 = vsyncadd [#allocation4], 4294967168 }
   0xf   :  { %172 = dma.done.wait [#allocation7], 128  }
  0x10   :  { %173 = vsyncadd [#allocation7], 4294967168 }
  0x11   :  { %84 = vsyncpa [#allocation3], 1 }
  0x12   :  { %85 = vsyncpa [#allocation4], 1 }
  0x13   :  { %86 = vsyncpa [#allocation7], 1 }

</bundles_post_ra>
